<compile_context>
chip_gen: v7x
topology: tpu7x:2x2x1
jax: 0.10.0
libtpu: 0.0.40
codegen_flags: <defaults>
</compile_context>

<pallas_src>
import functools

import jax
import jax.numpy as jnp
from jax.experimental import pallas as pl
from jax.experimental.pallas import tpu as pltpu


# ----------------------------------------------------------------------------
# Fused kernel: layers1 stage-1 (block-diagonal Linear + ReLU) followed by the
# folded (layers1-out @ layers2-in) Linear + ReLU and the final projection.
# ----------------------------------------------------------------------------
def _sdnet_fused_kernel(x_ref, w1b_ref, b1t_ref, wf_ref, bf_ref, w22_ref,
                        scal_ref, o_ref):
    # x_ref : (tb, in*emb)        f32 lane-dense input tile
    # w1b   : (in*emb, in*hid1)   bf16 block-diagonal layers1 first weight
    # b1t   : (1, in*hid1)        f32 layers1 first bias, tiled per feature
    # wf    : (in*hid1, hid2)     bf16 fused (layers1-out @ layers2-in) weight
    # bf    : (1, hid2)           f32 fused bias
    # w22   : (1, hid2)           f32 layers2 second weight as a row
    # scal  : SMEM [l2_b2]
    # o_ref : (tb, 1)
    x = x_ref[...].astype(jnp.bfloat16)
    h1 = jnp.dot(x, w1b_ref[...], preferred_element_type=jnp.float32)
    h1 = jnp.maximum(h1 + b1t_ref[...], 0.0)                      # f32 VPU
    h2 = jnp.dot(h1.astype(jnp.bfloat16), wf_ref[...],
                 preferred_element_type=jnp.float32)
    h2 = jnp.maximum(h2 + bf_ref[...], 0.0)
    # (hid2, 1) projection as VPU multiply + XLU lane reduce (no skinny MXU op)
    out = jnp.sum(h2 * w22_ref[...], axis=-1, keepdims=True)
    o_ref[...] = out + scal_ref[0]


# ----------------------------------------------------------------------------
# layers2-only kernel (emb_size == 1 path: layers1 is Identity).
# ----------------------------------------------------------------------------
def _mlp2_kernel(x_ref, w1_ref, b1_ref, w2row_ref, scal_ref, o_ref):
    h = jnp.dot(x_ref[...].astype(jnp.bfloat16), w1_ref[...],
                preferred_element_type=jnp.float32)
    h = jnp.maximum(h + b1_ref[...], 0.0)
    o_ref[...] = jnp.sum(h * w2row_ref[...], axis=-1, keepdims=True) + scal_ref[0]


# ----------------------------------------------------------------------------
# Generation-aware VMEM limit & row-tile selection
# ----------------------------------------------------------------------------
@functools.lru_cache(maxsize=None)
def _vmem_capacity_bytes():
    try:
        return int(pltpu.get_tpu_info().vmem_capacity_bytes)
    except Exception:
        return 64 << 20          # conservative fallback (v7x per-TC VMEM)


def _vmem_limit_bytes():
    # ~40 MiB on v7x (64 MiB physical), ~80 MiB on v5e/v6e (128 MiB physical).
    return int(_vmem_capacity_bytes() * 5 // 8)


def _compiler_params(vmem_limit):
    return pltpu.CompilerParams(
        dimension_semantics=("parallel",),
        vmem_limit_bytes=int(vmem_limit),
    )


def _round8(v):
    return max(8, ((v + 7) // 8) * 8)


def _row_tile(n, bytes_per_row, resident_bytes, vmem_limit, *, max_tile=2048):
    """Largest row tile whose per-tile footprint (plus resident weights) fits
    the scoped-VMEM limit, rounded to a multiple of 8, capped so v7x's two
    TensorCores both get grid steps once the batch is large enough."""
    avail = max(vmem_limit - resident_bytes - (2 << 20), 1 << 20)
    t = int(avail // max(bytes_per_row, 1))
    t = max(8, min(max_tile, (t // 8) * 8))
    if n >= 1024:
        # Prefer >=2 (ideally 4) grid steps for v7x megacore sharding, but
        # never drop below 512 rows (HBM-roofline sweet spot on v5e/v6e).
        t = min(t, max(512, _round8((n + 3) // 4)))
    return n if n <= t else t


# ----------------------------------------------------------------------------
# pallas_call wrappers
# ----------------------------------------------------------------------------
def _sdnet_fused(x2d, w1bd, b1t, wf, bfused, w22row, scalars, *, tb, vmem_limit):
    n, k = x2d.shape
    return pl.pallas_call(
        _sdnet_fused_kernel,
        out_shape=jax.ShapeDtypeStruct((n, 1), jnp.float32),
        grid=(pl.cdiv(n, tb),),
        in_specs=[
            pl.BlockSpec((tb, k), lambda i: (i, 0)),              # x row tile
            pl.BlockSpec(w1bd.shape, lambda i: (0, 0)),           # resident weights
            pl.BlockSpec(b1t.shape, lambda i: (0, 0)),
            pl.BlockSpec(wf.shape, lambda i: (0, 0)),
            pl.BlockSpec(bfused.shape, lambda i: (0, 0)),
            pl.BlockSpec(w22row.shape, lambda i: (0, 0)),
            pl.BlockSpec(memory_space=pltpu.MemorySpace.SMEM),    # scalar bias
        ],
        out_specs=pl.BlockSpec((tb, 1), lambda i: (i, 0)),
        compiler_params=_compiler_params(vmem_limit),
    )(x2d, w1bd, b1t, wf, bfused, w22row, scalars)


def _mlp2_forward(x2d, w1, b1, w2row, scalars, *, tb, vmem_limit):
    n, d = x2d.shape
    h = w1.shape[1]
    return pl.pallas_call(
        _mlp2_kernel,
        out_shape=jax.ShapeDtypeStruct((n, 1), jnp.float32),
        grid=(pl.cdiv(n, tb),),
        in_specs=[
            pl.BlockSpec((tb, d), lambda i: (i, 0)),
            pl.BlockSpec((d, h), lambda i: (0, 0)),
            pl.BlockSpec((1, h), lambda i: (0, 0)),
            pl.BlockSpec((1, h), lambda i: (0, 0)),
            pl.BlockSpec(memory_space=pltpu.MemorySpace.SMEM),
        ],
        out_specs=pl.BlockSpec((tb, 1), lambda i: (i, 0)),
        compiler_params=_compiler_params(vmem_limit),
    )(x2d, w1, b1, w2row, scalars)


# ----------------------------------------------------------------------------
# SDNet parameters / packing / forward
# ----------------------------------------------------------------------------
def _linear_init(key, fan_in, fan_out):
    """Deterministic init mimicking torch.nn.Linear (uniform +-1/sqrt(fan_in))."""
    kw, kb = jax.random.split(key)
    bound = 1.0 / jnp.sqrt(jnp.float32(fan_in))
    w = jax.random.uniform(kw, (fan_in, fan_out), jnp.float32, -bound, bound)
    b = jax.random.uniform(kb, (1, fan_out), jnp.float32, -bound, bound)
    return w, b


def init_sdnet_params(key, in_size, emb_size, hid_size1, hid_size2):
    k1, k2, k3, k4 = jax.random.split(key, 4)
    params = {}
    if emb_size > 1:
        params["l1_w1"], params["l1_b1"] = _linear_init(k1, emb_size, hid_size1)
        params["l1_w2"], params["l1_b2"] = _linear_init(k2, hid_size1, 1)
    params["l2_w1"], params["l2_b1"] = _linear_init(k3, in_size, hid_size2)
    params["l2_w2"], params["l2_b2"] = _linear_init(k4, hid_size2, 1)
    return params


def pack_sdnet_params(params, *, in_size, emb_size):
    """One-time repack: block-diagonal layers1 stage-1 weight (bf16), the
    layers1-out @ layers2-in fold (bf16), f32 biases, SMEM scalar for the
    final output bias."""
    l2_w1 = params["l2_w1"].astype(jnp.float32)                    # (in, hid2)
    l2_b1 = params["l2_b1"].astype(jnp.float32)                    # (1, hid2)
    packed = {
        "l2_w2_row": params["l2_w2"].T.astype(jnp.float32),        # (1, hid2)
        "scalars": jnp.array([params["l2_b2"][0, 0]], jnp.float32),
    }
    if emb_size > 1:
        w1 = params["l1_w1"]                                       # (emb, hid1)
        b1 = params["l1_b1"]                                       # (1, hid1)
        w2 = params["l1_w2"][:, 0]                                 # (hid1,)
        l1_b2 = params["l1_b2"][0, 0]                              # scalar
        emb, h1 = w1.shape
        eye = jnp.eye(in_size, dtype=jnp.float32)
        packed["l1_w1_bd"] = jnp.einsum("ab,km->akbm", eye, w1).reshape(
            in_size * emb, in_size * h1).astype(jnp.bfloat16)      # block-diag
        packed["l1_b1_t"] = jnp.tile(b1, (1, in_size)).astype(jnp.float32)
        # Fold layers1 output Linear into layers2 first Linear (no ReLU between):
        #   Wf[f*hid1+h, o] = l1_w2[h] * l2_w1[f, o]
        packed["wf"] = jnp.einsum("h,fo->fho", w2, l2_w1).reshape(
            in_size * h1, l2_w1.shape[1]).astype(jnp.bfloat16)
        packed["b_fused"] = (l2_b1
                             + l1_b2 * jnp.sum(l2_w1, axis=0, keepdims=True))
    else:
        packed["l2_w1"] = l2_w1.astype(jnp.bfloat16)
        packed["l2_b1"] = l2_b1
    return packed


@functools.partial(jax.jit, static_argnames=("in_size", "emb_size"))
def sdnet_forward(packed, x, *, in_size, emb_size):
    vlim = _vmem_limit_bytes()
    if emb_size > 1:
        # Lane-dense (rows, in_size*emb_size) slab (free reshape).
        x2d = x.reshape(-1, in_size * emb_size)
        n, k = x2d.shape
        w1bd, wf = packed["l1_w1_bd"], packed["wf"]
        in_hid1, hid2 = wf.shape
        # Per-row footprint: 2x f32 x tile (double-buffered), f32+bf16 h1, h2.
        per_row = 2 * k * 4 + in_hid1 * 8 + hid2 * 8 + 16
        # Resident weights (constant-index BlockSpecs are still double-buffered).
        resident = 4 * (w1bd.size + wf.size) + 8 * (
            packed["l1_b1_t"].size + packed["b_fused"].size
            + packed["l2_w2_row"].size)
        tb = _row_tile(n, per_row, resident, vlim)
        return _sdnet_fused(x2d, w1bd, packed["l1_b1_t"], wf, packed["b_fused"],
                            packed["l2_w2_row"], packed["scalars"],
                            tb=tb, vmem_limit=vlim)
    x2d = x.reshape(-1, in_size)
    n, d = x2d.shape
    w1 = packed["l2_w1"]
    hid2 = w1.shape[1]
    per_row = 2 * d * 4 + hid2 * 8 + 16
    resident = 4 * w1.size + 8 * (packed["l2_b1"].size
                                  + packed["l2_w2_row"].size)
    tb = _row_tile(n, per_row, resident, vlim)
    return _mlp2_forward(x2d, w1, packed["l2_b1"], packed["l2_w2_row"],
                         packed["scalars"], tb=tb, vmem_limit=vlim)


def sdnet_forward_ref(params, x, *, in_size, emb_size):
    """Pure-JAX f32 reference (mirrors the PyTorch module's forward)."""
    if emb_size > 1:
        x = x.reshape(-1, emb_size)
        h = jnp.maximum(x @ params["l1_w1"] + params["l1_b1"], 0.0)
        x = h @ params["l1_w2"] + params["l1_b2"]
        x = x.reshape(-1, in_size)
    h = jnp.maximum(x @ params["l2_w1"] + params["l2_b1"], 0.0)
    return h @ params["l2_w2"] + params["l2_b2"]


if __name__ == "__main__":
    # SDNet(in_size=32, hid_size=32, emb_size=4) on a small batch.
    batch, in_size, emb_size, hid_size = 2, 32, 4, 32

    key = jax.random.PRNGKey(0)
    kp, kx = jax.random.split(key)
    params = init_sdnet_params(kp, in_size, emb_size, hid_size, hid_size)
    packed = pack_sdnet_params(params, in_size=in_size, emb_size=emb_size)
    x = jax.random.normal(kx, (batch, in_size, emb_size), jnp.float32)

    y = sdnet_forward(packed, x, in_size=in_size, emb_size=emb_size)
    jax.block_until_ready(y)

    y_ref = sdnet_forward_ref(params, x, in_size=in_size, emb_size=emb_size)
    assert y.shape == (batch, 1), y.shape
    # bf16 MXU inputs (f32 accumulation) -> looser tolerance than pure f32.
    assert jnp.allclose(y, y_ref, atol=5e-2, rtol=5e-2), (y, y_ref)

    print("KERNEL_OK")
</pallas_src>

<mosaic_0001>
module attributes {stable_mosaic.version = 11 : i64} {
  func.func @_sdnet_fused_kernel(%arg0: i32, %arg1: memref<2x128xf32, #tpu.memory_space<vmem>>, %arg2: memref<128x1024xbf16, #tpu.memory_space<vmem>>, %arg3: memref<1x1024xf32, #tpu.memory_space<vmem>>, %arg4: memref<1024x32xbf16, #tpu.memory_space<vmem>>, %arg5: memref<1x32xf32, #tpu.memory_space<vmem>>, %arg6: memref<1x32xf32, #tpu.memory_space<vmem>>, %arg7: memref<1xf32, #tpu.memory_space<smem>>, %arg8: memref<2x1xf32, #tpu.memory_space<vmem>>) attributes {dimension_semantics = [#tpu.dimension_semantics<parallel>], iteration_bounds = array<i64: 1>, scalar_prefetch = 0 : i64, scratch_operands = 0 : i64, tpu.core_type = #tpu.core_type<tc>, window_params = [{transform_indices = @transform_0, window_bounds = array<i64: 2, 128>}, {pipeline_mode = #tpu.pipeline_mode<synchronous>, transform_indices = @transform_1, window_bounds = array<i64: 128, 1024>}, {pipeline_mode = #tpu.pipeline_mode<synchronous>, transform_indices = @transform_2, window_bounds = array<i64: 1, 1024>}, {pipeline_mode = #tpu.pipeline_mode<synchronous>, transform_indices = @transform_3, window_bounds = array<i64: 1024, 32>}, {pipeline_mode = #tpu.pipeline_mode<synchronous>, transform_indices = @transform_4, window_bounds = array<i64: 1, 32>}, {pipeline_mode = #tpu.pipeline_mode<synchronous>, transform_indices = @transform_5, window_bounds = array<i64: 1, 32>}, {transform_indices = @transform_6, window_bounds = array<i64: 1>}, {transform_indices = @transform_7, window_bounds = array<i64: 2, 1>}]} {
    %c0 = arith.constant 0 : index
    %c0_0 = arith.constant 0 : index
    %0 = vector.load %arg1[%c0, %c0_0] : memref<2x128xf32, #tpu.memory_space<vmem>>, vector<2x128xf32>
    %1 = arith.truncf %0 : vector<2x128xf32> to vector<2x128xbf16>
    %c0_1 = arith.constant 0 : index
    %c0_2 = arith.constant 0 : index
    %2 = vector.load %arg2[%c0_1, %c0_2] : memref<128x1024xbf16, #tpu.memory_space<vmem>>, vector<128x1024xbf16>
    %cst = arith.constant dense<0.000000e+00> : vector<2x1024xf32>
    %3 = tpu.matmul %1, %2, %cst {dimension_numbers = #tpu.dot_dimension_numbers<[1], [0], [0], [1], [0, 0, 1, 1], [], []>} : vector<2x128xbf16>, vector<128x1024xbf16>, vector<2x1024xf32> -> vector<2x1024xf32>
    %c0_3 = arith.constant 0 : index
    %c0_4 = arith.constant 0 : index
    %4 = vector.load %arg3[%c0_3, %c0_4] : memref<1x1024xf32, #tpu.memory_space<vmem>>, vector<1x1024xf32>
    %5 = vector.broadcast %4 : vector<1x1024xf32> to vector<2x1024xf32>
    %6 = arith.addf %3, %5 : vector<2x1024xf32>
    %cst_5 = arith.constant 0.000000e+00 : f32
    %7 = vector.broadcast %cst_5 : f32 to vector<2x1024xf32>
    %8 = arith.maximumf %6, %7 : vector<2x1024xf32>
    %9 = arith.truncf %8 : vector<2x1024xf32> to vector<2x1024xbf16>
    %c0_6 = arith.constant 0 : index
    %c0_7 = arith.constant 0 : index
    %10 = vector.load %arg4[%c0_6, %c0_7] : memref<1024x32xbf16, #tpu.memory_space<vmem>>, vector<1024x32xbf16>
    %cst_8 = arith.constant dense<0.000000e+00> : vector<2x32xf32>
    %11 = tpu.matmul %9, %10, %cst_8 {dimension_numbers = #tpu.dot_dimension_numbers<[1], [0], [0], [1], [0, 0, 1, 1], [], []>} : vector<2x1024xbf16>, vector<1024x32xbf16>, vector<2x32xf32> -> vector<2x32xf32>
    %c0_9 = arith.constant 0 : index
    %c0_10 = arith.constant 0 : index
    %12 = vector.load %arg5[%c0_9, %c0_10] : memref<1x32xf32, #tpu.memory_space<vmem>>, vector<1x32xf32>
    %13 = vector.broadcast %12 : vector<1x32xf32> to vector<2x32xf32>
    %14 = arith.addf %11, %13 : vector<2x32xf32>
    %cst_11 = arith.constant 0.000000e+00 : f32
    %15 = vector.broadcast %cst_11 : f32 to vector<2x32xf32>
    %16 = arith.maximumf %14, %15 : vector<2x32xf32>
    %c0_12 = arith.constant 0 : index
    %c0_13 = arith.constant 0 : index
    %17 = vector.load %arg6[%c0_12, %c0_13] : memref<1x32xf32, #tpu.memory_space<vmem>>, vector<1x32xf32>
    %18 = vector.broadcast %17 : vector<1x32xf32> to vector<2x32xf32>
    %19 = arith.mulf %16, %18 : vector<2x32xf32>
    %cst_14 = arith.constant dense<0.000000e+00> : vector<2xf32>
    %20 = vector.multi_reduction <add>, %19, %cst_14 [1] : vector<2x32xf32> to vector<2xf32>
    %21 = vector.shape_cast %20 : vector<2xf32> to vector<2x1xf32>
    %c0_15 = arith.constant 0 : index
    %22 = memref.load %arg7[%c0_15] : memref<1xf32, #tpu.memory_space<smem>>
    %23 = vector.broadcast %22 : f32 to vector<2x1xf32>
    %24 = arith.addf %21, %23 : vector<2x1xf32>
    %c0_16 = arith.constant 0 : index
    %c0_17 = arith.constant 0 : index
    %25 = vector.load %arg8[%c0_16, %c0_17] : memref<2x1xf32, #tpu.memory_space<vmem>>, vector<2x1xf32>
    tpu.vector_store %arg8[%c0_16, %c0_17], %24 {strides = array<i32>} : memref<2x1xf32, #tpu.memory_space<vmem>>, vector<2x1xf32>,
    return
  }
  func.func @transform_0(%arg0: i32) -> (i32, i32) {
    %c0_i32 = arith.constant 0 : i32
    %c0_i32_0 = arith.constant 0 : i32
    return %arg0, %c0_i32 : i32, i32
  }
  func.func @transform_1(%arg0: i32) -> (i32, i32) {
    %c0_i32 = arith.constant 0 : i32
    %c0_i32_0 = arith.constant 0 : i32
    %c0_i32_1 = arith.constant 0 : i32
    return %c0_i32, %c0_i32_0 : i32, i32
  }
  func.func @transform_2(%arg0: i32) -> (i32, i32) {
    %c0_i32 = arith.constant 0 : i32
    %c0_i32_0 = arith.constant 0 : i32
    %c0_i32_1 = arith.constant 0 : i32
    return %c0_i32, %c0_i32_0 : i32, i32
  }
  func.func @transform_3(%arg0: i32) -> (i32, i32) {
    %c0_i32 = arith.constant 0 : i32
    %c0_i32_0 = arith.constant 0 : i32
    %c0_i32_1 = arith.constant 0 : i32
    return %c0_i32, %c0_i32_0 : i32, i32
  }
  func.func @transform_4(%arg0: i32) -> (i32, i32) {
    %c0_i32 = arith.constant 0 : i32
    %c0_i32_0 = arith.constant 0 : i32
    %c0_i32_1 = arith.constant 0 : i32
    return %c0_i32, %c0_i32_0 : i32, i32
  }
  func.func @transform_5(%arg0: i32) -> (i32, i32) {
    %c0_i32 = arith.constant 0 : i32
    %c0_i32_0 = arith.constant 0 : i32
    %c0_i32_1 = arith.constant 0 : i32
    return %c0_i32, %c0_i32_0 : i32, i32
  }
  func.func @transform_6(%arg0: i32) -> i32 {
    %c0_i32 = arith.constant 0 : i32
    %c0_i32_0 = arith.constant 0 : i32
    return %c0_i32 : i32
  }
  func.func @transform_7(%arg0: i32) -> (i32, i32) {
    %c0_i32 = arith.constant 0 : i32
    %c0_i32_0 = arith.constant 0 : i32
    return %arg0, %c0_i32 : i32, i32
  }
}

</mosaic_0001>

<bundles_post_ra>
// kernel: sdnet_forward.1
= control target key start
LH: loop header
LB: loop body
LE: loop exit
PB: predicated region body
PF: predicated region fallthrough
CT: control target
= control target key end

     0   :  { %v1620_v3 = vmov 0   ;;  %vm1324_vm0 = vcmask 254976   ;;  %vm1331_vm1 = vcmask 1024   ;;  %s2093_s1 = inlined_call_operand.vmem [shape: bf16[128,1024], index: 1, kind: input, shape index: {}]   ;;  %s2094_s3 = inlined_call_operand.vmem [shape: bf16[1024,32], index: 3, kind: input, shape index: {}]   ;;  %s2095_s0 = inlined_call_operand.vmem [shape: f32[2,128], index: 0, kind: input, shape index: {}]   ;;  %s2096_s2 = inlined_call_operand.vmem [shape: f32[1,1024], index: 2, kind: input, shape index: {}]   ;;  %s2097_s4 = inlined_call_operand.vmem [shape: f32[1,32], index: 4, kind: input, shape index: {}]   ;;  %s2098_s5 = inlined_call_operand.vmem [shape: f32[1,32], index: 5, kind: input, shape index: {}]   ;;  %s2099_s6 = inlined_call_operand.<no memory space> [shape: f32[1], index: 6, kind: input, shape index: {}]   ;;  %s2100_s7 = inlined_call_operand.vmem [shape: f32[2,1], index: 7, kind: output, shape index: {}]  }
   0x1   :  { %v30_v0 = vld [vmem:[%s2093_s1] sm:$0xff]  ;;  %v31_v2 = vld [vmem:[%s2093_s1 + $0x8] sm:$0xff]  ;;  %488 = vmatprep.mubr.bf16.mxu0 %v1620_v3  ;;  %529 = vmatprep.mubr.bf16.mxu1 %v1620_v3  ;;  %v32_v60 = vld [vmem:[%s2093_s1 + $0x10] sm:$0xff] }
   0x2   :  { %v34_v1 = vld [vmem:[%s2093_s1 + $0x20] sm:$0xff]  ;;  %v35_v5 = vld [vmem:[%s2093_s1 + $0x28] sm:$0xff]  ;;  %v36_v63 = vld [vmem:[%s2093_s1 + $0x30] sm:$0xff] }
   0x3   :  { %v1338_v4 = vcombine.high %v30_v0, %v34_v1  ;;  %v1337_v6 = vcombine.low %v30_v0, %v34_v1  ;;  %v38_v7 = vld [vmem:[%s2093_s1 + $0x40] sm:$0xff]  ;;  %v1340_v9 = vcombine.high %v31_v2, %v35_v5  ;;  %v1339_v10 = vcombine.low %v31_v2, %v35_v5  ;;  %v39_v12 = vld [vmem:[%s2093_s1 + $0x48] sm:$0xff]  ;;  %v33_v2 = vld [vmem:[%s2093_s1 + $0x18] sm:$0xff] }
   0x4   :  { %v42_v8 = vld [vmem:[%s2093_s1 + $0x60] sm:$0xff]  ;;  %v43_v13 = vld [vmem:[%s2093_s1 + $0x68] sm:$0xff] }
   0x5   :  { %v1346_v11 = vcombine.high %v38_v7, %v42_v8  ;;  %v46_v14 = vld [vmem:[%s2093_s1 + $0x80] sm:$0xff]  ;;  %456 = vmatprep.subr.bf16.mxu0 %v1338_v4  ;;  %v1348_v15 = vcombine.high %v39_v12, %v43_v13  ;;  %v47_v17 = vld [vmem:[%s2093_s1 + $0x88] sm:$0xff]  ;;  %497 = vmatprep.subr.bf16.mxu1 %v1340_v9  ;;  %v1345_v19 = vcombine.low %v38_v7, %v42_v8  ;;  %v37_v4 = vld [vmem:[%s2093_s1 + $0x38] sm:$0xff] }
   0x6   :  { %v50_v16 = vld [vmem:[%s2093_s1 + $0xa0] sm:$0xff]  ;;  %v51_v18 = vld [vmem:[%s2093_s1 + $0xa8] sm:$0xff]  ;;  %457 = vmatpush1.bf16.msra.mxu0 %v1337_v6  ;;  %498 = vmatpush1.bf16.msra.mxu1 %v1339_v10  ;;  %v1347_v20 = vcombine.low %v39_v12, %v43_v13  ;;  %v40_v6 = vld [vmem:[%s2093_s1 + $0x50] sm:$0xff]  ;;  %v1342_v8 = vcombine.high %v32_v60, %v36_v63  ;;  %v1344_v10 = vcombine.high %v33_v2, %v37_v4 }
   0x7   :  { %458 = vmatprep.subr.bf16.mxu0 %v1346_v11  ;;  %v1354_v21 = vcombine.high %v46_v14, %v50_v16  ;;  %499 = vmatprep.subr.bf16.mxu1 %v1348_v15  ;;  %v1356_v22 = vcombine.high %v47_v17, %v51_v18  ;;  %v54_v23 = vld [vmem:[%s2093_s1 + $0xc0] sm:$0xff]  ;;  %v55_v25 = vld [vmem:[%s2093_s1 + $0xc8] sm:$0xff]  ;;  %v1353_v27 = vcombine.low %v46_v14, %v50_v16  ;;  %v44_v9 = vld [vmem:[%s2093_s1 + $0x70] sm:$0xff] }
   0x8   :  { %v58_v24 = vld [vmem:[%s2093_s1 + $0xe0] sm:$0xff]  ;;  %v59_v26 = vld [vmem:[%s2093_s1 + $0xe8] sm:$0xff]  ;;  %v1355_v28 = vcombine.low %v47_v17, %v51_v18  ;;  %v41_v11 = vld [vmem:[%s2093_s1 + $0x58] sm:$0xff]  ;;  %v1341_v14 = vcombine.low %v32_v60, %v36_v63  ;;  %v1343_v16 = vcombine.low %v33_v2, %v37_v4  ;;  %v1350_v17 = vcombine.high %v40_v6, %v44_v9 }
   0x9   :  { %v1362_v29 = vcombine.high %v54_v23, %v58_v24  ;;  %v1364_v30 = vcombine.high %v55_v25, %v59_v26  ;;  %v62_v31 = vld [vmem:[%s2093_s1 + $0x100] sm:$0xff]  ;;  %v63_v33 = vld [vmem:[%s2093_s1 + $0x108] sm:$0xff]  ;;  %v1361_v35 = vcombine.low %v54_v23, %v58_v24  ;;  %v1363_v36 = vcombine.low %v55_v25, %v59_v26  ;;  %v45_v13 = vld [vmem:[%s2093_s1 + $0x78] sm:$0xff] }
   0xa   :  { %459 = vmatpush1.bf16.msra.mxu0 %v1345_v19  ;;  %500 = vmatpush1.bf16.msra.mxu1 %v1347_v20  ;;  %v66_v32 = vld [vmem:[%s2093_s1 + $0x120] sm:$0xff]  ;;  %v67_v34 = vld [vmem:[%s2093_s1 + $0x128] sm:$0xff]  ;;  %v48_v15 = vld [vmem:[%s2093_s1 + $0x90] sm:$0xff]  ;;  %v1352_v19 = vcombine.high %v41_v11, %v45_v13  ;;  %v1351_v24 = vcombine.low %v41_v11, %v45_v13 }
   0xb   :  { %460 = vmatprep.subr.bf16.mxu0 %v1354_v21  ;;  %501 = vmatprep.subr.bf16.mxu1 %v1356_v22  ;;  %v1370_v37 = vcombine.high %v62_v31, %v66_v32  ;;  %v1372_v38 = vcombine.high %v63_v33, %v67_v34  ;;  %v70_v39 = vld [vmem:[%s2093_s1 + $0x140] sm:$0xff]  ;;  %v71_v41 = vld [vmem:[%s2093_s1 + $0x148] sm:$0xff]  ;;  %v1369_v43 = vcombine.low %v62_v31, %v66_v32  ;;  %v52_v18 = vld [vmem:[%s2093_s1 + $0xb0] sm:$0xff] }
   0xc   :  { %v74_v40 = vld [vmem:[%s2093_s1 + $0x160] sm:$0xff]  ;;  %v75_v42 = vld [vmem:[%s2093_s1 + $0x168] sm:$0xff]  ;;  %v1371_v44 = vcombine.low %v63_v33, %v67_v34  ;;  %v49_v20 = vld [vmem:[%s2093_s1 + $0x98] sm:$0xff]  ;;  %v1349_v22 = vcombine.low %v40_v6, %v44_v9  ;;  %v1358_v25 = vcombine.high %v48_v15, %v52_v18 }
   0xd   :  { %v1378_v45 = vcombine.high %v70_v39, %v74_v40  ;;  %v1380_v46 = vcombine.high %v71_v41, %v75_v42  ;;  %v78_v47 = vld [vmem:[%s2093_s1 + $0x180] sm:$0xff]  ;;  %v79_v49 = vld [vmem:[%s2093_s1 + $0x188] sm:$0xff]  ;;  %v1377_v51 = vcombine.low %v70_v39, %v74_v40  ;;  %v1379_v52 = vcombine.low %v71_v41, %v75_v42  ;;  %v53_v21 = vld [vmem:[%s2093_s1 + $0xb8] sm:$0xff] }
   0xe   :  { %461 = vmatpush1.bf16.msra.mxu0 %v1353_v27  ;;  %502 = vmatpush1.bf16.msra.mxu1 %v1355_v28  ;;  %v82_v48 = vld [vmem:[%s2093_s1 + $0x1a0] sm:$0xff]  ;;  %v83_v50 = vld [vmem:[%s2093_s1 + $0x1a8] sm:$0xff]  ;;  %v56_v23 = vld [vmem:[%s2093_s1 + $0xd0] sm:$0xff]  ;;  %v1360_v27 = vcombine.high %v49_v20, %v53_v21  ;;  %v1359_v32 = vcombine.low %v49_v20, %v53_v21 }
   0xf   :  { %462 = vmatprep.subr.bf16.mxu0 %v1362_v29  ;;  %503 = vmatprep.subr.bf16.mxu1 %v1364_v30  ;;  %v1386_v53 = vcombine.high %v78_v47, %v82_v48  ;;  %v86_v54 = vld [vmem:[%s2093_s1 + $0x1c0] sm:$0xff]  ;;  %v1388_v56 = vcombine.high %v79_v49, %v83_v50  ;;  %v87_v57 = vld [vmem:[%s2093_s1 + $0x1c8] sm:$0xff]  ;;  %v1385_v59 = vcombine.low %v78_v47, %v82_v48  ;;  %v60_v26 = vld [vmem:[%s2093_s1 + $0xf0] sm:$0xff] }
  0x10   :  { %v90_v55 = vld [vmem:[%s2093_s1 + $0x1e0] sm:$0xff]  ;;  %v91_v58 = vld [vmem:[%s2093_s1 + $0x1e8] sm:$0xff]  ;;  %v1387_v61 = vcombine.low %v79_v49, %v83_v50  ;;  %v57_v28 = vld [vmem:[%s2093_s1 + $0xd8] sm:$0xff]  ;;  %v1357_v30 = vcombine.low %v48_v15, %v52_v18  ;;  %v1366_v33 = vcombine.high %v56_v23, %v60_v26 }
  0x11   :  { %v1394_v62 = vcombine.high %v86_v54, %v90_v55  ;;  %v1396_v0 = vcombine.high %v87_v57, %v91_v58  ;;  %v28_v1 = vld [vmem:[%s2095_s0] sm:$0x3]  ;;  %v1393_v5 = vcombine.low %v86_v54, %v90_v55  ;;  %v1395_v7 = vcombine.low %v87_v57, %v91_v58  ;;  %v61_v29 = vld [vmem:[%s2093_s1 + $0xf8] sm:$0xff]  ;;  %v64_v31 = vld [vmem:[%s2093_s1 + $0x110] sm:$0xff] }
  0x12   :  { %463 = vmatpush1.bf16.msra.mxu0 %v1361_v35  ;;  %504 = vmatpush1.bf16.msra.mxu1 %v1363_v36  ;;  %v1783_v12 = vpack.c.bf16 %v28_v1, %v28_v1  ;;  %v68_v34 = vld [vmem:[%s2093_s1 + $0x130] sm:$0xff]  ;;  %v1368_v35 = vcombine.high %v57_v28, %v61_v29  ;;  %v69_v36 = vld [vmem:[%s2093_s1 + $0x138] sm:$0xff]  ;;  %v1367_v40 = vcombine.low %v57_v28, %v61_v29  ;;  %v1556_v1 = vld [vmem:[%s2094_s3 + $0x40] sm:$0xff]  }
  0x13   :  { %464 = vmatprep.subr.bf16.mxu0 %v1370_v37  ;;  %505 = vmatprep.subr.bf16.mxu1 %v1372_v38  ;;  %v1365_v37 = vcombine.low %v56_v23, %v60_v26  ;;  %v72_v38 = vld [vmem:[%s2093_s1 + $0x150] sm:$0xff]  ;;  %v1374_v41 = vcombine.high %v64_v31, %v68_v34  ;;  %v73_v42 = vld [vmem:[%s2093_s1 + $0x158] sm:$0xff]  ;;  %v1557_v4 = vld [vmem:[%s2094_s3 + $0xc0] sm:$0xff]  }
  0x14   :  { %v76_v39 = vld [vmem:[%s2093_s1 + $0x170] sm:$0xff]  ;;  %v81_v50 = vld [vmem:[%s2093_s1 + $0x198] sm:$0xff]  ;;  %v1558_v6 = vld [vmem:[%s2094_s3] sm:$0xff]  }
  0x15   :  { %v84_v47 = vld [vmem:[%s2093_s1 + $0x1b0] sm:$0xff]  ;;  %v1382_v49 = vcombine.high %v72_v38, %v76_v39  ;;  %v89_v58 = vld [vmem:[%s2093_s1 + $0x1d8] sm:$0xff]  ;;  %v1561_v9 = vld [vmem:[%s2094_s3 + $0xc8] sm:$0xff]  }
  0x16   :  { %465 = vmatpush1.bf16.msra.mxu0 %v1369_v43  ;;  %506 = vmatpush1.bf16.msra.mxu1 %v1371_v44  ;;  %v77_v43 = vld [vmem:[%s2093_s1 + $0x178] sm:$0xff]  ;;  %v88_v54 = vld [vmem:[%s2093_s1 + $0x1d0] sm:$0xff]  ;;  %v1563_v11 = vld [vmem:[%s2094_s3 + $0x88] sm:$0xff]  }
  0x17   :  { %466 = vmatprep.subr.bf16.mxu0 %v1378_v45  ;;  %507 = vmatprep.subr.bf16.mxu1 %v1380_v46  ;;  %v1373_v45 = vcombine.low %v64_v31, %v68_v34  ;;  %v80_v46 = vld [vmem:[%s2093_s1 + $0x190] sm:$0xff]  ;;  %v1570_v18 = vld [vmem:[%s2094_s3 + $0x18] sm:$0xff]   ;;  %v1572_v20 = vld [vmem:[%s2094_s3 + $0x60] sm:$0xff]  }
  0x18   :  { %v92_v55 = vld [vmem:[%s2093_s1 + $0x1f0] sm:$0xff]  ;;  %v1390_v57 = vcombine.high %v80_v46, %v84_v47  ;;  %v1573_v21 = vld [vmem:[%s2094_s3 + $0xe0] sm:$0xff]   ;;  %v1578_v26 = vld [vmem:[%s2094_s3 + $0x28] sm:$0xff]  }
  0x19   :  { %v1398_v63 = vcombine.high %v88_v54, %v92_v55  ;;  %v1397_v2 = vcombine.low %v88_v54, %v92_v55  ;;  %v1564_v13 = vld [vmem:[%s2094_s3 + $0x50] sm:$0xff]   ;;  %v1575_v23 = vld [vmem:[%s2094_s3 + $0xa0] sm:$0xff]   ;;  %v1586_v34 = vld [vmem:[%s2094_s3 + $0x38] sm:$0xff]  }
  0x1a   :  { %467 = vmatpush1.bf16.msra.mxu0 %v1377_v51  ;;  %508 = vmatpush1.bf16.msra.mxu1 %v1379_v52  ;;  %v85_v51 = vld [vmem:[%s2093_s1 + $0x1b8] sm:$0xff]  ;;  %v1384_v52 = vcombine.high %v73_v42, %v77_v43  ;;  %v1566_v15 = vld [vmem:[%s2094_s3 + $0x10] sm:$0xff]  }
  0x1b   :  { %468 = vmatprep.subr.bf16.mxu0 %v1386_v53  ;;  %509 = vmatprep.subr.bf16.mxu1 %v1388_v56  ;;  %v1381_v53 = vcombine.low %v72_v38, %v76_v39  ;;  %v1383_v56 = vcombine.low %v73_v42, %v77_v43  ;;  %v1392_v60 = vcombine.high %v81_v50, %v85_v51  ;;  %v1580_v28 = vld [vmem:[%s2094_s3 + $0x70] sm:$0xff]  }
  0x1c   :  { %v1581_v29 = vld [vmem:[%s2094_s3 + $0xf0] sm:$0xff]  }
  0x1d   :  { %v1583_v31 = vld [vmem:[%s2094_s3 + $0xb0] sm:$0xff]  }
  0x1e   :  { %469 = vmatpush1.bf16.msra.mxu0 %v1385_v59  ;;  %510 = vmatpush1.bf16.msra.mxu1 %v1387_v61  ;;  %v93_v59 = vld [vmem:[%s2093_s1 + $0x1f8] sm:$0xff]  ;;  %v1389_v61 = vcombine.low %v80_v46, %v84_v47 }
  0x1f   :  { %470 = vmatprep.subr.bf16.mxu0 %v1394_v62  ;;  %511 = vmatprep.subr.bf16.mxu1 %v1396_v0  ;;  %v1391_v62 = vcombine.low %v81_v50, %v85_v51  ;;  %v1400_v0 = vcombine.high %v89_v58, %v93_v59 }
  0x22   :  { %471 = vmatpush1.bf16.msra.mxu0 %v1393_v5  ;;  %512 = vmatpush1.bf16.msra.mxu1 %v1395_v7  ;;  %v1399_v5 = vcombine.low %v89_v58, %v93_v59  ;;  %v1559_v7 = vld [vmem:[%s2094_s3 + $0x80] sm:$0xff]  }
  0x23   :  { %538 = vmatprep.subr.bf16.mxu0 %v1342_v8  ;;  %579 = vmatprep.subr.bf16.mxu1 %v1344_v10  ;;  %v1560_v8 = vld [vmem:[%s2094_s3 + $0x48] sm:$0xff]  }
  0x24   :  { %v1562_v10 = vld [vmem:[%s2094_s3 + $0x8] sm:$0xff]  }
  0x25   :  { %489 = vmatmul.mubr.bf16.vlgmr.msra.gmra.mrb[0].mxu0 %v1783_v12  ;;  %530 = vmatmul.mubr.bf16.vlgmr.msra.gmra.mrb[0].mxu1 %v1783_v12 }
  0x26   :  { %539 = vmatpush1.bf16.msra.mxu0 %v1341_v14  ;;  %580 = vmatpush1.bf16.msra.mxu1 %v1343_v16  ;;  %v1565_v14 = vld [vmem:[%s2094_s3 + $0xd0] sm:$0xff]  }
  0x27   :  { %540 = vmatprep.subr.bf16.mxu0 %v1350_v17  ;;  %581 = vmatprep.subr.bf16.mxu1 %v1352_v19  ;;  %v1567_v16 = vld [vmem:[%s2094_s3 + $0x90] sm:$0xff]   ;;  %v1569_v17 = vld [vmem:[%s2094_s3 + $0xd8] sm:$0xff]  }
  0x28   :  { %570 = vmatprep.mubr.bf16.mxu0 %v1620_v3  ;;  %611 = vmatprep.mubr.bf16.mxu1 %v1620_v3  ;;  %v65_v3 = vld [vmem:[%s2093_s1 + $0x118] sm:$0xff] }
  0x29   :  { %v1376_v44 = vcombine.high %v65_v3, %v69_v36  ;;  %v1375_v48 = vcombine.low %v65_v3, %v69_v36  ;;  %v1571_v19 = vld [vmem:[%s2094_s3 + $0x98] sm:$0xff]   ;;  %v1588_v3 = vld [vmem:[%s2094_s3 + $0x140] sm:$0xff]  }
  0x2a   :  { %541 = vmatpush1.bf16.msra.mxu0 %v1349_v22  ;;  %582 = vmatpush1.bf16.msra.mxu1 %v1351_v24  ;;  %v1574_v22 = vld [vmem:[%s2094_s3 + $0x20] sm:$0xff]   ;;  %v1576_v24 = vld [vmem:[%s2094_s3 + $0x68] sm:$0xff]  }
  0x2b   :  { %542 = vmatprep.subr.bf16.mxu0 %v1358_v25  ;;  %583 = vmatprep.subr.bf16.mxu1 %v1360_v27  ;;  %v1577_v25 = vld [vmem:[%s2094_s3 + $0xe8] sm:$0xff]   ;;  %v1589_v36 = vld [vmem:[%s2094_s3 + $0x1c0] sm:$0xff]  }
  0x2c   :  { %v1579_v27 = vld [vmem:[%s2094_s3 + $0xa8] sm:$0xff]  }
  0x2e   :  { %543 = vmatpush1.bf16.msra.mxu0 %v1357_v30  ;;  %584 = vmatpush1.bf16.msra.mxu1 %v1359_v32  ;;  %v1582_v30 = vld [vmem:[%s2094_s3 + $0x30] sm:$0xff]   ;;  %v1584_v32 = vld [vmem:[%s2094_s3 + $0x78] sm:$0xff]  }
  0x2f   :  { %544 = vmatprep.subr.bf16.mxu0 %v1366_v33  ;;  %585 = vmatprep.subr.bf16.mxu1 %v1368_v35  ;;  %v1585_v33 = vld [vmem:[%s2094_s3 + $0xf8] sm:$0xff]  }
  0x30   :  { %v1587_v35 = vld [vmem:[%s2094_s3 + $0xb8] sm:$0xff]  }
  0x32   :  { %545 = vmatpush1.bf16.msra.mxu0 %v1365_v37  ;;  %586 = vmatpush1.bf16.msra.mxu1 %v1367_v40  ;;  %v96_v37 = vlaneseq  ;;  %v1974_v40 = vld [vmem:[%s2096_s2] sm:$0xff] }
  0x33   :  { %546 = vmatprep.subr.bf16.mxu0 %v1374_v41  ;;  %587 = vmatprep.subr.bf16.mxu1 %v1376_v44 }
  0x34   :  { %v1968_v38 = vshrl.u32 %v96_v37, 7  ;;  %v1615_v37 = vld [vmem:[%s2094_s3 + $0x1b0] sm:$0xff]  }
  0x36   :  { %547 = vmatpush1.bf16.msra.mxu0 %v1373_v45  ;;  %588 = vmatpush1.bf16.msra.mxu1 %v1375_v48  ;;  %v98_v39 = vsub.s32 0, %v1968_v38  ;;  %v106_v41 = vsub.s32 2, %v1968_v38  ;;  %v102_v42 = vsub.s32 1, %v1968_v38  ;;  %v110_v43 = vsub.s32 3, %v1968_v38 }
  0x37   :  { %548 = vmatprep.subr.bf16.mxu0 %v1382_v49  ;;  %589 = vmatprep.subr.bf16.mxu1 %v1384_v52 }
  0x38   :  { %v99_v44 = vrot.slane %v1974_v40, %v98_v39  ;;  %v107_v45 = vrot.slane %v1974_v40, %v106_v41  ;;  %v103_v46 = vrot.slane %v1974_v40, %v102_v42  ;;  %v111_v47 = vrot.slane %v1974_v40, %v110_v43  ;;  %v1617_v41 = vld [vmem:[%s2094_s3 + $0x1f8] sm:$0xff]  }
  0x3a   :  { %549 = vmatpush1.bf16.msra.mxu0 %v1381_v53  ;;  %590 = vmatpush1.bf16.msra.mxu1 %v1383_v56 }
  0x3b   :  { %550 = vmatprep.subr.bf16.mxu0 %v1390_v57  ;;  %591 = vmatprep.subr.bf16.mxu1 %v1392_v60 }
  0x3e   :  { %551 = vmatpush1.bf16.msra.mxu0 %v1389_v61  ;;  %592 = vmatpush1.bf16.msra.mxu1 %v1391_v62 }
  0x3f   :  { %552 = vmatprep.subr.bf16.mxu0 %v1398_v63  ;;  %593 = vmatprep.subr.bf16.mxu1 %v1400_v0 }
  0x42   :  { %553 = vmatpush1.bf16.msra.mxu0 %v1397_v2  ;;  %594 = vmatpush1.bf16.msra.mxu1 %v1399_v5 }
  0x43   :  { %1467 = vmatprep.subr.bf16.mxu0 %v1556_v1  ;;  %1489 = vmatprep.subr.bf16.mxu1 %v1557_v4  ;;  %v1590_v4 = vld [vmem:[%s2094_s3 + $0x100] sm:$0xff]  }
  0x45   :  { %571 = vmatmul.mubr.bf16.vlgmr.msra.gmra.mrb[4].mxu0 %v1783_v12  ;;  %612 = vmatmul.mubr.bf16.vlgmr.msra.gmra.mrb[4].mxu1 %v1783_v12  ;;  %v1568_v12 = vld [vmem:[%s2094_s3 + $0x58] sm:$0xff]  }
  0x46   :  { %1468 = vmatpush3.bf16.msra.mxu0 %v1558_v6  ;;  %1490 = vmatpush3.bf16.msra.mxu1 %v1559_v7  ;;  %v1591_v6 = vld [vmem:[%s2094_s3 + $0x180] sm:$0xff]   ;;  %v1592_v7 = vld [vmem:[%s2094_s3 + $0x148] sm:$0xff]  }
  0x47   :  { %1469 = vmatprep.subr.bf16.mxu0 %v1560_v8  ;;  %1491 = vmatprep.subr.bf16.mxu1 %v1561_v9  ;;  %v1593_v8 = vld [vmem:[%s2094_s3 + $0x1c8] sm:$0xff]  }
  0x48   :  { %v1594_v9 = vld [vmem:[%s2094_s3 + $0x108] sm:$0xff]  }
  0x4a   :  { %1470 = vmatpush3.bf16.msra.mxu0 %v1562_v10  ;;  %1492 = vmatpush3.bf16.msra.mxu1 %v1563_v11  ;;  %v1595_v10 = vld [vmem:[%s2094_s3 + $0x188] sm:$0xff]   ;;  %v1596_v11 = vld [vmem:[%s2094_s3 + $0x150] sm:$0xff]  }
  0x4b   :  { %1471 = vmatprep.subr.bf16.mxu0 %v1564_v13  ;;  %1493 = vmatprep.subr.bf16.mxu1 %v1565_v14  ;;  %v1597_v13 = vld [vmem:[%s2094_s3 + $0x1d0] sm:$0xff]  }
  0x4c   :  { %v1598_v14 = vld [vmem:[%s2094_s3 + $0x110] sm:$0xff]  }
  0x4e   :  { %1472 = vmatpush3.bf16.msra.mxu0 %v1566_v15  ;;  %1494 = vmatpush3.bf16.msra.mxu1 %v1567_v16  ;;  %v1599_v15 = vld [vmem:[%s2094_s3 + $0x190] sm:$0xff]   ;;  %v1600_v16 = vld [vmem:[%s2094_s3 + $0x158] sm:$0xff]  }
  0x4f   :  { %1473 = vmatprep.subr.bf16.mxu0 %v1568_v12  ;;  %1495 = vmatprep.subr.bf16.mxu1 %v1569_v17  ;;  %v1601_v12 = vld [vmem:[%s2094_s3 + $0x1d8] sm:$0xff]  }
  0x50   :  { %v1602_v17 = vld [vmem:[%s2094_s3 + $0x118] sm:$0xff]  }
  0x52   :  { %1474 = vmatpush3.bf16.msra.mxu0 %v1570_v18  ;;  %1496 = vmatpush3.bf16.msra.mxu1 %v1571_v19  ;;  %v1603_v18 = vld [vmem:[%s2094_s3 + $0x198] sm:$0xff]   ;;  %v1604_v19 = vld [vmem:[%s2094_s3 + $0x160] sm:$0xff]  }
  0x53   :  { %1475 = vmatprep.subr.bf16.mxu0 %v1572_v20  ;;  %1497 = vmatprep.subr.bf16.mxu1 %v1573_v21  ;;  %v1605_v20 = vld [vmem:[%s2094_s3 + $0x1e0] sm:$0xff]  }
  0x54   :  { %v1606_v21 = vld [vmem:[%s2094_s3 + $0x120] sm:$0xff]  }
  0x56   :  { %1476 = vmatpush3.bf16.msra.mxu0 %v1574_v22  ;;  %1498 = vmatpush3.bf16.msra.mxu1 %v1575_v23  ;;  %v1607_v22 = vld [vmem:[%s2094_s3 + $0x1a0] sm:$0xff]   ;;  %v1608_v23 = vld [vmem:[%s2094_s3 + $0x168] sm:$0xff]  }
  0x57   :  { %1477 = vmatprep.subr.bf16.mxu0 %v1576_v24  ;;  %1499 = vmatprep.subr.bf16.mxu1 %v1577_v25  ;;  %v1609_v24 = vld [vmem:[%s2094_s3 + $0x1e8] sm:$0xff]   ;;  %v114_v25 = vsub.s32 4, %v1968_v38 }
  0x5a   :  { %1478 = vmatpush3.bf16.msra.mxu0 %v1578_v26  ;;  %1500 = vmatpush3.bf16.msra.mxu1 %v1579_v27  ;;  %v1610_v26 = vld [vmem:[%s2094_s3 + $0x128] sm:$0xff]   ;;  %v122_v27 = vsub.s32 6, %v1968_v38 }
  0x5b   :  { %1479 = vmatprep.subr.bf16.mxu0 %v1580_v28  ;;  %1501 = vmatprep.subr.bf16.mxu1 %v1581_v29  ;;  %v118_v28 = vsub.s32 5, %v1968_v38  ;;  %v1611_v29 = vld [vmem:[%s2094_s3 + $0x1a8] sm:$0xff]  }
  0x5e   :  { %1480 = vmatpush3.bf16.msra.mxu0 %v1582_v30  ;;  %1502 = vmatpush3.bf16.msra.mxu1 %v1583_v31  ;;  %v126_v30 = vsub.s32 7, %v1968_v38  ;;  %v1612_v31 = vld [vmem:[%s2094_s3 + $0x170] sm:$0xff]   ;;  %v1616_v38 = vld [vmem:[%s2094_s3 + $0x178] sm:$0xff]  }
  0x5f   :  { %1481 = vmatprep.subr.bf16.mxu0 %v1584_v32  ;;  %1503 = vmatprep.subr.bf16.mxu1 %v1585_v33  ;;  %v1613_v32 = vld [vmem:[%s2094_s3 + $0x1f0] sm:$0xff]   ;;  %v115_v33 = vrot.slane %v1974_v40, %v114_v25 }
  0x62   :  { %1482 = vmatpush3.bf16.msra.mxu0 %v1586_v34  ;;  %1504 = vmatpush3.bf16.msra.mxu1 %v1587_v35  ;;  %v123_v34 = vrot.slane %v1974_v40, %v122_v27  ;;  %v119_v35 = vrot.slane %v1974_v40, %v118_v28  ;;  %v1329_v28 = vstv %s2099_s6 }
  0x63   :  { %1511 = vmatprep.subr.bf16.mxu0 %v1588_v3  ;;  %1533 = vmatprep.subr.bf16.mxu1 %v1589_v36  ;;  %v1614_v3 = vld [vmem:[%s2094_s3 + $0x130] sm:$0xff]   ;;  %v127_v36 = vrot.slane %v1974_v40, %v126_v30 }
  0xf8   :  { %v490_v48 = vpop.f32.mrb[0].mxu0  ;;  %v531_v50 = vpop.f32.mrb[0].mxu1 }
  0xf9   :  { %v491_v49 = vadd.f32 %v490_v48, %v99_v44  ;;  %v492_v51 = vpop.f32.mrb[1].mxu0  ;;  %v532_v52 = vadd.f32 %v531_v50, %v107_v45  ;;  %v533_v54 = vpop.f32.mrb[1].mxu1  ;;  %v1618_v48 = vld [vmem:[%s2094_s3 + $0x138] sm:$0xff]  }
  0xfa   :  { %v493_v53 = vadd.f32 %v492_v51, %v103_v46  ;;  %v494_v55 = vpop.f32.mrb[2].mxu0  ;;  %v534_v57 = vadd.f32 %v533_v54, %v111_v47  ;;  %v535_v58 = vpop.f32.mrb[2].mxu1 }
  0xfb   :  { %v620_v56 = vmax.f32 %v491_v49, 0.0  ;;  %v495_v59 = vpop.f32.mrb[3].mxu0  ;;  %v622_v60 = vmax.f32 %v532_v52, 0.0  ;;  %v536_v62 = vpop.f32.mrb[3].mxu1 }
  0xfc   :  { %v621_v61 = vmax.f32 %v493_v53, 0.0  ;;  %v623_v0 = vmax.f32 %v534_v57, 0.0  ;;  %v1619_v53 = vld [vmem:[%s2094_s3 + $0x1b8] sm:$0xff]  }
  0xfd   :  { %v628_v63 = vpack.c.bf16 %v620_v56, %v620_v56  ;;  %v630_v1 = vpack.c.bf16 %v622_v60, %v622_v60 }
  0xfe   :  { %v629_v2 = vpack.c.bf16 %v621_v61, %v621_v61  ;;  %v631_v5 = vpack.c.bf16 %v623_v0, %v623_v0  ;;  %v1401_v0 = vld [vmem:[%s2097_s4] ss:$0 sm:$0xff] }
 0x100   :  { %1187 = vmatprep.mubr.bf16.mxu0 %v629_v2  ;;  %1227 = vmatprep.mubr.bf16.mxu1 %v631_v5 }
 0x101   :  { %1188 = vmatmul.mubr.bf16.vlgmr.msra.gmra.mrb[8].mxu0 %v628_v63  ;;  %1228 = vmatmul.mubr.bf16.vlgmr.msra.gmra.mrb[8].mxu1 %v630_v1 }
 0x102   :  { %1512 = vmatpush3.bf16.msra.mxu0 %v1590_v4  ;;  %1534 = vmatpush3.bf16.msra.mxu1 %v1591_v6 }
 0x103   :  { %1513 = vmatprep.subr.bf16.mxu0 %v1592_v7  ;;  %1535 = vmatprep.subr.bf16.mxu1 %v1593_v8 }
 0x106   :  { %1514 = vmatpush3.bf16.msra.mxu0 %v1594_v9  ;;  %1536 = vmatpush3.bf16.msra.mxu1 %v1595_v10 }
 0x107   :  { %1515 = vmatprep.subr.bf16.mxu0 %v1596_v11  ;;  %1537 = vmatprep.subr.bf16.mxu1 %v1597_v13 }
 0x10a   :  { %1516 = vmatpush3.bf16.msra.mxu0 %v1598_v14  ;;  %1538 = vmatpush3.bf16.msra.mxu1 %v1599_v15 }
 0x10b   :  { %1517 = vmatprep.subr.bf16.mxu0 %v1600_v16  ;;  %1539 = vmatprep.subr.bf16.mxu1 %v1601_v12 }
 0x10e   :  { %1518 = vmatpush3.bf16.msra.mxu0 %v1602_v17  ;;  %1540 = vmatpush3.bf16.msra.mxu1 %v1603_v18 }
 0x10f   :  { %1519 = vmatprep.subr.bf16.mxu0 %v1604_v19  ;;  %1541 = vmatprep.subr.bf16.mxu1 %v1605_v20 }
 0x112   :  { %1520 = vmatpush3.bf16.msra.mxu0 %v1606_v21  ;;  %1542 = vmatpush3.bf16.msra.mxu1 %v1607_v22 }
 0x113   :  { %1521 = vmatprep.subr.bf16.mxu0 %v1608_v23  ;;  %1543 = vmatprep.subr.bf16.mxu1 %v1609_v24  ;;  %v1466_v24 = vld [vmem:[%s2098_s5] ss:$0 sm:$0xff] }
 0x116   :  { %1522 = vmatpush3.bf16.msra.mxu0 %v1610_v26  ;;  %1544 = vmatpush3.bf16.msra.mxu1 %v1611_v29 }
 0x117   :  { %1523 = vmatprep.subr.bf16.mxu0 %v1612_v31  ;;  %1545 = vmatprep.subr.bf16.mxu1 %v1613_v32 }
 0x118   :  { %v572_v39 = vpop.f32.mrb[4].mxu0  ;;  %v613_v43 = vpop.f32.mrb[4].mxu1 }
 0x119   :  { %v573_v42 = vadd.f32 %v572_v39, %v115_v33  ;;  %v574_v44 = vpop.f32.mrb[5].mxu0  ;;  %v614_v45 = vadd.f32 %v613_v43, %v123_v34  ;;  %v615_v46 = vpop.f32.mrb[5].mxu1 }
 0x11a   :  { %v575_v40 = vadd.f32 %v574_v44, %v119_v35  ;;  %v576_v47 = vpop.f32.mrb[6].mxu0  ;;  %1524 = vmatpush3.bf16.msra.mxu0 %v1614_v3  ;;  %v616_v50 = vadd.f32 %v615_v46, %v127_v36  ;;  %v617_v51 = vpop.f32.mrb[6].mxu1  ;;  %1546 = vmatpush3.bf16.msra.mxu1 %v1615_v37 }
 0x11b   :  { %v624_v49 = vmax.f32 %v573_v42, 0.0  ;;  %v577_v52 = vpop.f32.mrb[7].mxu0  ;;  %1525 = vmatprep.subr.bf16.mxu0 %v1616_v38  ;;  %v626_v54 = vmax.f32 %v614_v45, 0.0  ;;  %v618_v56 = vpop.f32.mrb[7].mxu1  ;;  %1547 = vmatprep.subr.bf16.mxu1 %v1617_v41 }
 0x11c   :  { %v625_v55 = vmax.f32 %v575_v40, 0.0  ;;  %v627_v57 = vmax.f32 %v616_v50, 0.0 }
 0x11d   :  { %v634_v58 = vpack.c.bf16 %v626_v54, %v626_v54  ;;  %v632_v60 = vpack.c.bf16 %v624_v49, %v624_v49 }
 0x11e   :  { %v633_v59 = vpack.c.bf16 %v625_v55, %v625_v55  ;;  %1526 = vmatpush3.bf16.msra.mxu0 %v1618_v48  ;;  %v635_v61 = vpack.c.bf16 %v627_v57, %v627_v57  ;;  %1548 = vmatpush3.bf16.msra.mxu1 %v1619_v53 }
 0x120   :  { %1267 = vmatprep.mubr.bf16.mxu0 %v633_v59  ;;  %1307 = vmatprep.mubr.bf16.mxu1 %v635_v61 }
 0x121   :  { %1268 = vmatmul.mubr.bf16.vlgmr.msra.gmra.mrb[12].mxu0 %v632_v60  ;;  %1308 = vmatmul.mubr.bf16.vlgmr.msra.gmra.mrb[12].mxu1 %v634_v58 }
 0x1d4   :  { %v1483_v62 = vpop.f32.mrb[8].mxu0  ;;  %v1505_v63 = vpop.f32.mrb[8].mxu1 }
 0x1d5   :  { %v1484_v1 = vpop.f32.mrb[9].mxu0  ;;  %v1506_v4 = vpop.f32.mrb[9].mxu1 }
 0x1d6   :  { %v1485_v2 = vadd.f32 %v1484_v1, %v1483_v62  ;;  %v1486_v5 = vpop.f32.mrb[10].mxu0  ;;  %v1507_v6 = vadd.f32 %v1506_v4, %v1505_v63  ;;  %v1508_v7 = vpop.f32.mrb[10].mxu1 }
 0x1d7   :  { %v1487_v8 = vpop.f32.mrb[11].mxu0  ;;  %v1509_v10 = vpop.f32.mrb[11].mxu1 }
 0x1d8   :  { %v1190_v9 = vadd.f32 %v1485_v2, %v1401_v0 }
 0x1da   :  { %v1230_v11 = vadd.f32 %v1507_v6, %v1190_v9 }
 0x1f4   :  { %v1527_v13 = vpop.f32.mrb[12].mxu0  ;;  %v1549_v14 = vpop.f32.mrb[12].mxu1 }
 0x1f5   :  { %v1528_v15 = vpop.f32.mrb[13].mxu0  ;;  %v1550_v12 = vpop.f32.mrb[13].mxu1 }
 0x1f6   :  { %v1529_v16 = vadd.f32 %v1528_v15, %v1527_v13  ;;  %v1530_v17 = vpop.f32.mrb[14].mxu0  ;;  %v1551_v18 = vadd.f32 %v1550_v12, %v1549_v14  ;;  %v1552_v19 = vpop.f32.mrb[14].mxu1 }
 0x1f7   :  { %v1531_v20 = vpop.f32.mrb[15].mxu0  ;;  %v1553_v22 = vpop.f32.mrb[15].mxu1 }
 0x1f8   :  { %v1270_v21 = vadd.f32 %v1529_v16, %v1230_v11 }
 0x1fa   :  { %v1310_v23 = vadd.f32 %v1551_v18, %v1270_v21 }
 0x1fc   :  { %v1315_v25 = vmax.f32 %v1310_v23, 0.0 }
 0x1fe   :  { %v1323_v26 = vmul.f32 %v1466_v24, %v1315_v25 }
 0x200   :  { %v1325_v27 = vsel %vm1324_vm0, %v1323_v26, 0.0 }
 0x201   :  { %1326 = vadd.xlane.f32.xlu0 %v1325_v27 }
 0x28e   :  { %v1327_v29 = vpop.xlane.xlu0 %1326 }
 0x28f   :  { %v1330_v30 = vadd.f32 %v1329_v28, %v1327_v29 }
 0x291   :  { %1332 = vst.msk [vmem:[%s2100_s7] sm:$0x3] %vm1331_vm1, %v1330_v30 }

</bundles_post_ra>
